<compile_context>
chip_gen: v6e
topology: v6e:2x2x1
jax: 0.10.0
libtpu: 0.0.40
codegen_flags: <defaults>
</compile_context>

<pallas_src>
import functools

import jax
import jax.numpy as jnp
from jax import lax
from jax.experimental import pallas as pl
from jax.experimental.pallas import tpu as pltpu

LANE = 128
SUBLANE = 8


def _round_up(n, m):
    return ((n + m - 1) // m) * m


def _pick_tile(dim_padded, max_tile, step=LANE):
    """Largest multiple of `step` that divides dim_padded and is <= max_tile."""
    best = step
    t = step
    while t <= min(dim_padded, max_tile):
        if dim_padded % t == 0:
            best = t
        t += step
    return best


def _linear_add_decay_kernel(x_ref, w_ref, b_ref, d_ref, h_ref,
                             out_ref, hn_ref, acc_ref, *, use_bf16):
    """Grid = (batch tiles i, out tiles j, K tiles k). Accumulate x @ W^T over k."""
    k = pl.program_id(2)

    @pl.when(k == 0)
    def _():
        acc_ref[...] = jnp.zeros_like(acc_ref)

    xt = x_ref[...]
    wt = w_ref[...]
    if use_bf16:
        xt = xt.astype(jnp.bfloat16)
        wt = wt.astype(jnp.bfloat16)
    # (TB, TK) contracted with (TN, TK) over the last dim of both -> (TB, TN).
    acc_ref[...] += lax.dot_general(
        xt, wt,
        dimension_numbers=(((1,), (1,)), ((), ())),
        preferred_element_type=jnp.float32)

    @pl.when(k == pl.num_programs(2) - 1)
    def _():
        # f32 epilogue (VPU + EUP tanh): fc + bias, h*decay, tanh.
        fc = acc_ref[...] + b_ref[...]
        h_n = h_ref[...].astype(jnp.float32) * d_ref[...] + fc
        hn_ref[...] = h_n.astype(hn_ref.dtype)
        out_ref[...] = jnp.tanh(h_n).astype(out_ref.dtype)


def linear_add_decay(x, h, weight, bias, decay_rate, *, use_bf16_matmul=True):
    """x: (B, inp), h: (B, out), weight: (out, inp), bias: (out,), decay: (out,).

    Returns (tanh(h_n), h_n), each (B, out), matching LinearAddDecay.forward.
    """
    B, inp = x.shape
    out = weight.shape[0]
    out_dtype = x.dtype

    # Padded / tiled sizes: lane-dense feature dims, sublane-aligned batch.
    OUT_P = _round_up(out, LANE)
    INP_P = _round_up(inp, LANE)
    TK = _pick_tile(INP_P, max_tile=512)
    TN = _pick_tile(OUT_P, max_tile=512)
    B_P = _round_up(B, SUBLANE)
    TB = min(256, B_P)
    B_P = _round_up(B_P, TB)

    def pad2(a, rows, cols):
        pr, pc = rows - a.shape[0], cols - a.shape[1]
        return jnp.pad(a, ((0, pr), (0, pc))) if (pr or pc) else a

    x_p = pad2(x, B_P, INP_P)                         # zero-padded K cols: no effect on fc
    w_p = pad2(weight, OUT_P, INP_P)
    h_p = pad2(h, B_P, OUT_P)
    b_p = pad2(bias.reshape(1, out), 1, OUT_P)
    d_p = pad2(decay_rate.reshape(1, out), 1, OUT_P)

    grid = (B_P // TB, OUT_P // TN, INP_P // TK)      # reduction axis last
    kernel = functools.partial(_linear_add_decay_kernel, use_bf16=use_bf16_matmul)

    out_p, hn_p = pl.pallas_call(
        kernel,
        out_shape=(
            jax.ShapeDtypeStruct((B_P, OUT_P), out_dtype),   # tanh(h_n)
            jax.ShapeDtypeStruct((B_P, OUT_P), out_dtype),   # h_n
        ),
        grid=grid,
        in_specs=[
            pl.BlockSpec((TB, TK), lambda i, j, k: (i, k)),     # x          streamed over k
            pl.BlockSpec((TN, TK), lambda i, j, k: (j, k)),     # weight     resident over batch
            pl.BlockSpec((1, TN), lambda i, j, k: (0, j)),      # bias       resident over i,k
            pl.BlockSpec((1, TN), lambda i, j, k: (0, j)),      # decay_rate resident over i,k
            pl.BlockSpec((TB, TN), lambda i, j, k: (i, j)),     # h          resident over k
        ],
        out_specs=(
            pl.BlockSpec((TB, TN), lambda i, j, k: (i, j)),     # tanh(h_n)
            pl.BlockSpec((TB, TN), lambda i, j, k: (i, j)),     # h_n
        ),
        scratch_shapes=[pltpu.VMEM((TB, TN), jnp.float32)],
        compiler_params=pltpu.CompilerParams(
            dimension_semantics=("parallel", "parallel", "arbitrary"),
            vmem_limit_bytes=48 << 20,
        ),
    )(x_p, w_p, b_p, d_p, h_p)

    if (B_P, OUT_P) != (B, out):
        out_p = out_p[:B, :out]
        hn_p = hn_p[:B, :out]
    return out_p, hn_p


if __name__ == "__main__":
    key = jax.random.PRNGKey(0)
    k_x, k_h, k_w, k_b, k_d = jax.random.split(key, 5)

    B, INP, OUT = 8, 32, 32

    # Deterministic synthetic parameters (shapes per module __init__):
    #   nn.Linear(inp, out): weight (out, inp), bias (out,), init U(-1/sqrt(inp), 1/sqrt(inp))
    #   decay_rate: abs(U(0,1)) * 0.7 + 0.1, shape (out,)
    bound = 1.0 / jnp.sqrt(jnp.float32(INP))
    weight = jax.random.uniform(k_w, (OUT, INP), jnp.float32, -bound, bound)
    bias = jax.random.uniform(k_b, (OUT,), jnp.float32, -bound, bound)
    decay_rate = jnp.abs(jax.random.uniform(k_d, (OUT,), jnp.float32)) * 0.7 + 0.1

    x = jax.random.normal(k_x, (B, INP), jnp.float32)
    h = jax.random.normal(k_h, (B, OUT), jnp.float32)

    out_act, h_n = linear_add_decay(x, h, weight, bias, decay_rate)
    jax.block_until_ready((out_act, h_n))

    # Pure-JAX f32 reference. Tolerance loosened because the kernel runs the
    # matmul in bf16 on the MXU (f32 accumulation + f32 epilogue).
    fc_ref = x @ weight.T + bias
    h_n_ref = h * decay_rate + fc_ref
    out_ref = jnp.tanh(h_n_ref)
    assert out_act.shape == (B, OUT) and h_n.shape == (B, OUT)
    assert jnp.allclose(h_n, h_n_ref, atol=2e-2, rtol=2e-2), "h_n mismatch"
    assert jnp.allclose(out_act, out_ref, atol=2e-2, rtol=2e-2), "out mismatch"

    print("KERNEL_OK")
</pallas_src>

<mosaic_0001>
module attributes {stable_mosaic.version = 11 : i64} {
  func.func @_linear_add_decay_kernel(%arg0: i32, %arg1: i32, %arg2: i32, %arg3: memref<8x128xf32, #tpu.memory_space<vmem>>, %arg4: memref<128x128xf32, #tpu.memory_space<vmem>>, %arg5: memref<1x128xf32, #tpu.memory_space<vmem>>, %arg6: memref<1x128xf32, #tpu.memory_space<vmem>>, %arg7: memref<8x128xf32, #tpu.memory_space<vmem>>, %arg8: memref<8x128xf32, #tpu.memory_space<vmem>>, %arg9: memref<8x128xf32, #tpu.memory_space<vmem>>, %arg10: memref<8x128xf32, #tpu.memory_space<vmem>>) attributes {dimension_semantics = [#tpu.dimension_semantics<parallel>, #tpu.dimension_semantics<parallel>, #tpu.dimension_semantics<arbitrary>], iteration_bounds = array<i64: 1, 1, 1>, scalar_prefetch = 0 : i64, scratch_operands = 1 : i64, tpu.core_type = #tpu.core_type<tc>, window_params = [{transform_indices = @transform_0, window_bounds = array<i64: 8, 128>}, {transform_indices = @transform_1, window_bounds = array<i64: 128, 128>}, {transform_indices = @transform_2, window_bounds = array<i64: 1, 128>}, {transform_indices = @transform_3, window_bounds = array<i64: 1, 128>}, {transform_indices = @transform_4, window_bounds = array<i64: 8, 128>}, {transform_indices = @transform_5, window_bounds = array<i64: 8, 128>}, {transform_indices = @transform_6, window_bounds = array<i64: 8, 128>}]} {
    %c0_i32 = arith.constant 0 : i32
    %0 = arith.cmpi eq, %arg2, %c0_i32 : i32
    %1 = arith.extui %0 : i1 to i32
    %c0_i32_0 = arith.constant 0 : i32
    %2 = arith.cmpi ne, %1, %c0_i32_0 : i32
    scf.if %2 {
      %cst_10 = arith.constant 0.000000e+00 : f32
      %14 = vector.broadcast %cst_10 : f32 to vector<8x128xf32>
      %c0_11 = arith.constant 0 : index
      %c0_12 = arith.constant 0 : index
      %15 = vector.load %arg10[%c0_11, %c0_12] : memref<8x128xf32, #tpu.memory_space<vmem>>, vector<8x128xf32>
      tpu.vector_store %arg10[%c0_11, %c0_12], %14 {strides = array<i32>} : memref<8x128xf32, #tpu.memory_space<vmem>>, vector<8x128xf32>,
    } else {
    }
    %c0 = arith.constant 0 : index
    %c0_1 = arith.constant 0 : index
    %3 = vector.load %arg3[%c0, %c0_1] : memref<8x128xf32, #tpu.memory_space<vmem>>, vector<8x128xf32>
    %c0_2 = arith.constant 0 : index
    %c0_3 = arith.constant 0 : index
    %4 = vector.load %arg4[%c0_2, %c0_3] : memref<128x128xf32, #tpu.memory_space<vmem>>, vector<128x128xf32>
    %5 = arith.truncf %3 : vector<8x128xf32> to vector<8x128xbf16>
    %6 = arith.truncf %4 : vector<128x128xf32> to vector<128x128xbf16>
    %c0_4 = arith.constant 0 : index
    %c0_5 = arith.constant 0 : index
    %7 = vector.load %arg10[%c0_4, %c0_5] : memref<8x128xf32, #tpu.memory_space<vmem>>, vector<8x128xf32>
    %cst = arith.constant dense<0.000000e+00> : vector<8x128xf32>
    %8 = tpu.matmul %5, %6, %cst {dimension_numbers = #tpu.dot_dimension_numbers<[1], [1], [0], [0], [0, 0, 1, 0], [], []>} : vector<8x128xbf16>, vector<128x128xbf16>, vector<8x128xf32> -> vector<8x128xf32>
    %9 = arith.addf %7, %8 : vector<8x128xf32>
    %c0_6 = arith.constant 0 : index
    %c0_7 = arith.constant 0 : index
    %10 = vector.load %arg10[%c0_6, %c0_7] : memref<8x128xf32, #tpu.memory_space<vmem>>, vector<8x128xf32>
    tpu.vector_store %arg10[%c0_6, %c0_7], %9 {strides = array<i32>} : memref<8x128xf32, #tpu.memory_space<vmem>>, vector<8x128xf32>,
    %c0_i32_8 = arith.constant 0 : i32
    %11 = arith.cmpi eq, %arg2, %c0_i32_8 : i32
    %12 = arith.extui %11 : i1 to i32
    %c0_i32_9 = arith.constant 0 : i32
    %13 = arith.cmpi ne, %12, %c0_i32_9 : i32
    scf.if %13 {
      %c0_10 = arith.constant 0 : index
      %c0_11 = arith.constant 0 : index
      %14 = vector.load %arg10[%c0_10, %c0_11] : memref<8x128xf32, #tpu.memory_space<vmem>>, vector<8x128xf32>
      %c0_12 = arith.constant 0 : index
      %c0_13 = arith.constant 0 : index
      %15 = vector.load %arg5[%c0_12, %c0_13] : memref<1x128xf32, #tpu.memory_space<vmem>>, vector<1x128xf32>
      %16 = vector.broadcast %15 : vector<1x128xf32> to vector<8x128xf32>
      %17 = arith.addf %14, %16 : vector<8x128xf32>
      %c0_14 = arith.constant 0 : index
      %c0_15 = arith.constant 0 : index
      %18 = vector.load %arg7[%c0_14, %c0_15] : memref<8x128xf32, #tpu.memory_space<vmem>>, vector<8x128xf32>
      %c0_16 = arith.constant 0 : index
      %c0_17 = arith.constant 0 : index
      %19 = vector.load %arg6[%c0_16, %c0_17] : memref<1x128xf32, #tpu.memory_space<vmem>>, vector<1x128xf32>
      %20 = vector.broadcast %19 : vector<1x128xf32> to vector<8x128xf32>
      %21 = arith.mulf %18, %20 : vector<8x128xf32>
      %22 = arith.addf %21, %17 : vector<8x128xf32>
      %c0_18 = arith.constant 0 : index
      %c0_19 = arith.constant 0 : index
      %23 = vector.load %arg9[%c0_18, %c0_19] : memref<8x128xf32, #tpu.memory_space<vmem>>, vector<8x128xf32>
      tpu.vector_store %arg9[%c0_18, %c0_19], %22 {strides = array<i32>} : memref<8x128xf32, #tpu.memory_space<vmem>>, vector<8x128xf32>,
      %24 = math.tanh %22 : vector<8x128xf32>
      %c0_20 = arith.constant 0 : index
      %c0_21 = arith.constant 0 : index
      %25 = vector.load %arg8[%c0_20, %c0_21] : memref<8x128xf32, #tpu.memory_space<vmem>>, vector<8x128xf32>
      tpu.vector_store %arg8[%c0_20, %c0_21], %24 {strides = array<i32>} : memref<8x128xf32, #tpu.memory_space<vmem>>, vector<8x128xf32>,
    } else {
    }
    return
  }
  func.func @transform_0(%arg0: i32, %arg1: i32, %arg2: i32) -> (i32, i32) {
    %c0_i32 = arith.constant 0 : i32
    return %arg0, %arg2 : i32, i32
  }
  func.func @transform_1(%arg0: i32, %arg1: i32, %arg2: i32) -> (i32, i32) {
    %c0_i32 = arith.constant 0 : i32
    return %arg1, %arg2 : i32, i32
  }
  func.func @transform_2(%arg0: i32, %arg1: i32, %arg2: i32) -> (i32, i32) {
    %c0_i32 = arith.constant 0 : i32
    %c0_i32_0 = arith.constant 0 : i32
    return %c0_i32, %arg1 : i32, i32
  }
  func.func @transform_3(%arg0: i32, %arg1: i32, %arg2: i32) -> (i32, i32) {
    %c0_i32 = arith.constant 0 : i32
    %c0_i32_0 = arith.constant 0 : i32
    return %c0_i32, %arg1 : i32, i32
  }
  func.func @transform_4(%arg0: i32, %arg1: i32, %arg2: i32) -> (i32, i32) {
    %c0_i32 = arith.constant 0 : i32
    return %arg0, %arg1 : i32, i32
  }
  func.func @transform_5(%arg0: i32, %arg1: i32, %arg2: i32) -> (i32, i32) {
    %c0_i32 = arith.constant 0 : i32
    return %arg0, %arg1 : i32, i32
  }
  func.func @transform_6(%arg0: i32, %arg1: i32, %arg2: i32) -> (i32, i32) {
    %c0_i32 = arith.constant 0 : i32
    return %arg0, %arg1 : i32, i32
  }
}

</mosaic_0001>

<bundles_post_ra>
// kernel: tpu_custom_call.1
= control target key start
LH: loop header
LB: loop body
LE: loop exit
PB: predicated region body
PF: predicated region fallthrough
CT: control target
= control target key end

     0   :  { %12 = vsyncpa [#allocation4], 0  ;;  %s406_s0 = inlined_call_operand.hbm [shape: f32[8,128], index: 0, kind: input, shape index: {}]   ;;  %s407_s1 = inlined_call_operand.hbm [shape: f32[128,128], index: 1, kind: input, shape index: {}]   ;;  %s408_s2 = inlined_call_operand.vmem [shape: f32[1,128], index: 2, kind: input, shape index: {}]   ;;  %s409_s3 = inlined_call_operand.vmem [shape: f32[1,128], index: 3, kind: input, shape index: {}]   ;;  %s410_s4 = inlined_call_operand.hbm [shape: f32[8,128], index: 4, kind: input, shape index: {}]   ;;  %s411_s5 = inlined_call_operand.hbm [shape: f32[8,128], index: 5, kind: output, shape index: {0}]   ;;  %s412_s6 = inlined_call_operand.hbm [shape: f32[8,128], index: 6, kind: output, shape index: {1}]  }
   0x1   :  { %13 = vsyncpa [#allocation7], 0 }
   0x2   :  { %14 = vsyncpa [#allocation5], 0 }
   0x3   :  { %15 = vsyncpa [#allocation11], 0  ;;  %s341_s21 = smov [#allocation6]  }
   0x4   :  { %s31_s22 = sshll.u32 %s341_s21, 4  ;;  %s32_s22 = int_to_ptr.vmem [resolvable:$true] %s31_s22 }
   0x5   :  { %s241_s23 = scalar_lea.vmem %s32_s22, 2048  ;;  %p246_p1 = scmp.lt.s32.totalorder %s32_s22, %s32_s22 }
   0x6   :  { %p242_p0 = scmp.ne.s32.totalorder %s32_s22, %s241_s23  ;;  %p247_p2 = scmp.lt.s32.totalorder %s241_s23, %s241_s23 }
   0x8   :  { %p248_p3 = por %p247_p2, %p246_p1 }
   0xa   :  { %p249_p4 = pnand %p248_p3, %p242_p0 }
   0xc   :  { %252 = shalt.err (!%p249_p4)
}
   0xd   :  { %s342_s24 = smov 128   ;;  %s343_s25 = smov 8  }
   0xe   :  { %37 = dma.hbm_to_vmem [thread:$0]  %s407_s1, 2048, %s32_s22, [#allocation7], %s342_s24, %s342_s24, %s343_s25  }
   0xf   :  { %s344_s28 = smov [#allocation3]   ;;  %s345_s30 = smov [#allocation8]  }
  0x10   :  { %s22_s29 = sshll.u32 %s344_s28, 4  ;;  %s48_s7 = sshll.u32 %s345_s30, 4  ;;  %s23_s29 = int_to_ptr.vmem [resolvable:$true] %s22_s29  ;;  %s49_s7 = int_to_ptr.vmem [resolvable:$true] %s48_s7 }
  0x11   :  { %s261_s8 = scalar_lea.vmem %s23_s29, 128  ;;  %p266_p6 = scmp.lt.s32.totalorder %s23_s29, %s23_s29 }
  0x12   :  { %p262_p5 = scmp.ne.s32.totalorder %s23_s29, %s261_s8  ;;  %p267_p7 = scmp.lt.s32.totalorder %s261_s8, %s261_s8 }
  0x14   :  { %p268_p8 = por %p267_p7, %p266_p6 }
  0x16   :  { %p269_p9 = pnand %p268_p8, %p262_p5 }
  0x18   :  { %272 = shalt.err (!%p269_p9)
}
  0x19   :  { %25 = dma.hbm_to_vmem [thread:$0]  %s406_s0, 128, %s23_s29, [#allocation4]  }
  0x1a   :  { %s281_s11 = scalar_lea.vmem %s49_s7, 128  ;;  %p286_p11 = scmp.lt.s32.totalorder %s49_s7, %s49_s7 }
  0x1b   :  { %p282_p10 = scmp.ne.s32.totalorder %s49_s7, %s281_s11  ;;  %p287_p12 = scmp.lt.s32.totalorder %s281_s11, %s281_s11 }
  0x1d   :  { %p288_p13 = por %p287_p12, %p286_p11 }
  0x1f   :  { %p289_p0 = pnand %p288_p13, %p282_p10 }
  0x21   :  { %292 = shalt.err (!%p289_p0)
}
  0x22   :  { %51 = dma.hbm_to_vmem [thread:$0]  %s410_s4, 128, %s49_s7, [#allocation7]  }
  0x23   :  { %333 = dma.done.wait [#allocation4], 128  }
  0x24   :  { %334 = vsyncadd [#allocation4], 4294967168 }
  0x25   :  { %335 = dma.done.wait [#allocation7], 2176  }
  0x26   :  { %336 = vsyncadd [#allocation7], 4294965120  ;;  %v346_v0 = vmov 0.0   ;;  %vm347_vm0 = vmmov 0   ;;  %v82_v1 = vld [vmem:[#allocation6 + $0x70] sm:$0xff]  ;;  %v83_v2 = vld [vmem:[#allocation6 + $0x78] sm:$0xff] }
  0x27   :  { %202 = vmatprep.subr.bf16.mxu0 %v346_v0  ;;  %218 = vmatprep.mubr.msk.bf16.mxu0 %vm347_vm0, %v346_v0  ;;  %v92_v3 = vpack.c.bf16 %v83_v2, %v82_v1  ;;  %v80_v4 = vld [vmem:[#allocation6 + $0x60] sm:$0xff]  ;;  %v81_v5 = vld [vmem:[#allocation6 + $0x68] sm:$0xff]  ;;  %v78_v7 = vld [vmem:[#allocation6 + $0x50] sm:$0xff]  ;;  %s348_s15 = smov [#allocation10]  }
  0x28   :  { %v91_v6 = vpack.c.bf16 %v81_v5, %v80_v4  ;;  %v79_v8 = vld [vmem:[#allocation6 + $0x58] sm:$0xff]  ;;  %v76_v10 = vld [vmem:[#allocation6 + $0x40] sm:$0xff]  ;;  %v77_v11 = vld [vmem:[#allocation6 + $0x48] sm:$0xff]  ;;  %s177_s16 = sshll.u32 %s348_s15, 4  ;;  %s178_s16 = int_to_ptr.vmem [resolvable:$true] %s177_s16 }
  0x29   :  { %203 = vmatpush3.bf16.xpose.msra.mxu0 %v92_v3  ;;  %v90_v9 = vpack.c.bf16 %v79_v8, %v78_v7  ;;  %v89_v12 = vpack.c.bf16 %v77_v11, %v76_v10  ;;  %v74_v13 = vld [vmem:[#allocation6 + $0x30] sm:$0xff]  ;;  %v75_v14 = vld [vmem:[#allocation6 + $0x38] sm:$0xff]  ;;  %v72_v16 = vld [vmem:[#allocation6 + $0x20] sm:$0xff]  ;;  %s293_s17 = scalar_lea.vmem %s178_s16, 128  ;;  %p298_p2 = scmp.lt.s32.totalorder %s178_s16, %s178_s16 }
  0x2a   :  { %204 = vmatprep.subr.bf16.mxu0 %v346_v0  ;;  %v88_v15 = vpack.c.bf16 %v75_v14, %v74_v13  ;;  %v73_v17 = vld [vmem:[#allocation6 + $0x28] sm:$0xff]  ;;  %v70_v19 = vld [vmem:[#allocation6 + $0x10] sm:$0xff]  ;;  %v71_v20 = vld [vmem:[#allocation6 + $0x18] sm:$0xff]  ;;  %p294_p1 = scmp.ne.s32.totalorder %s178_s16, %s293_s17  ;;  %p299_p3 = scmp.lt.s32.totalorder %s293_s17, %s293_s17 }
  0x2b   :  { %v87_v18 = vpack.c.bf16 %v73_v17, %v72_v16  ;;  %v86_v21 = vpack.c.bf16 %v71_v20, %v70_v19  ;;  %v68_v22 = vld [vmem:[#allocation6] sm:$0xff]  ;;  %v69_v23 = vld [vmem:[#allocation6 + $0x8] sm:$0xff]  ;;  %v67_v25 = vld [vmem:[#allocation3] sm:$0xff] }
  0x2c   :  { %v85_v24 = vpack.c.bf16 %v69_v23, %v68_v22  ;;  %v84_v26 = vpack.c.bf16 %v67_v25, %v67_v25  ;;  %v148_v27 = vld [vmem:[#allocation8] sm:$0xff]  ;;  %v192_v28 = vld [vmem:[%s409_s3] ss:$0 sm:$0xff]  ;;  %p300_p4 = por %p299_p3, %p298_p2 }
  0x2d   :  { %v191_v29 = vld [vmem:[%s408_s2] ss:$0 sm:$0xff]  ;;  %v156_v30 = vmul.f32 %v192_v28, %v148_v27 }
  0x2e   :  { %p301_p5 = pnand %p300_p4, %p294_p1 }
  0x31   :  { %205 = vmatpush3.bf16.xpose.msra.mxu0 %v91_v6 }
  0x32   :  { %206 = vmatprep.subr.bf16.mxu0 %v346_v0 }
  0x39   :  { %207 = vmatpush3.bf16.xpose.msra.mxu0 %v90_v9 }
  0x3a   :  { %208 = vmatprep.subr.bf16.mxu0 %v346_v0 }
  0x41   :  { %209 = vmatpush3.bf16.xpose.msra.mxu0 %v89_v12 }
  0x42   :  { %210 = vmatprep.subr.bf16.mxu0 %v346_v0 }
  0x49   :  { %211 = vmatpush3.bf16.xpose.msra.mxu0 %v88_v15 }
  0x4a   :  { %212 = vmatprep.subr.bf16.mxu0 %v346_v0 }
  0x51   :  { %213 = vmatpush3.bf16.xpose.msra.mxu0 %v87_v18 }
  0x52   :  { %214 = vmatprep.subr.bf16.mxu0 %v346_v0 }
  0x59   :  { %215 = vmatpush3.bf16.xpose.msra.mxu0 %v86_v21 }
  0x5a   :  { %216 = vmatprep.subr.bf16.mxu0 %v346_v0 }
  0x61   :  { %217 = vmatpush3.bf16.xpose.msra.mxu0 %v85_v24 }
  0x68   :  { %219 = vmatmul.mubr.bf16.vlgmr.msra.gmra.mxu0 %v84_v26 }
 0x128   :  { %v128_v31 = vpop.f32.mrf.mxu0 }
 0x129   :  { %v147_v32 = vadd.f32 %v191_v29, %v128_v31 }
 0x12a   :  { %v220_v33 = vpop.f32.mrf.mxu0 }
 0x12b   :  { %v157_v34 = vadd.f32 %v156_v30, %v147_v32 }
 0x12c   :  { %v131_v35 = vpop.f32.mrf.mxu0 }
 0x12d   :  { %231 = vtanh.f32 %v157_v34  ;;  %158 = vst [vmem:[#allocation10] sm:$0xff] %v157_v34 }
 0x12e   :  { %v221_v36 = vpop.f32.mrf.mxu0 }
 0x12f   :  { %304 = shalt.err (!%p301_p5)
}
 0x130   :  { %180 = dma.vmem_to_hbm [thread:$0]  %s178_s16, 128, %s412_s6, [#allocation11]  }
 0x131   :  { %s349_s18 = smov [#allocation9]  }
 0x132   :  { %s167_s19 = sshll.u32 %s349_s18, 4  ;;  %s168_s19 = int_to_ptr.vmem [resolvable:$true] %s167_s19 }
 0x133   :  { %s313_s20 = scalar_lea.vmem %s168_s19, 128  ;;  %p318_p7 = scmp.lt.s32.totalorder %s168_s19, %s168_s19 }
 0x134   :  { %p314_p6 = scmp.ne.s32.totalorder %s168_s19, %s313_s20  ;;  %p319_p8 = scmp.lt.s32.totalorder %s313_s20, %s313_s20 }
 0x136   :  { %p320_p9 = por %p319_p8, %p318_p7 }
 0x138   :  { %p321_p10 = pnand %p320_p9, %p314_p6 }
 0x13a   :  { %v232_v37 = vpop.eup %231 }
 0x13b   :  { %160 = vst [vmem:[#allocation9] sm:$0xff] %v232_v37 }
 0x13c   :  { %324 = shalt.err (!%p321_p10)
}
 0x13d   :  { %170 = dma.vmem_to_hbm [thread:$0]  %s168_s19, 128, %s411_s5, [#allocation5]  }
 0x13e   :  { %337 = dma.done.wait [#allocation5], 128  }
 0x13f   :  { %338 = vsyncadd [#allocation5], 4294967168 }
 0x140   :  { %339 = dma.done.wait [#allocation11], 128  }
 0x141   :  { %340 = vsyncadd [#allocation11], 4294967168 }
 0x142   :  { %187 = vsyncpa [#allocation4], 1 }
 0x143   :  { %188 = vsyncpa [#allocation7], 1 }
 0x144   :  { %189 = vsyncpa [#allocation5], 1 }
 0x145   :  { %190 = vsyncpa [#allocation11], 1 }

</bundles_post_ra>
